<compile_context>
chip_gen: v7x
topology: tpu7x:2x2x1
jax: 0.10.0
libtpu: 0.0.40
codegen_flags: <defaults>
</compile_context>

<pallas_src>
import jax
import jax.numpy as jnp
from jax.experimental import pallas as pl
from jax.experimental.pallas import tpu as pltpu


def _round_up(x, m):
    return ((x + m - 1) // m) * m


def _pick_tile_e(E, *, max_tile=8192, target_steps=4):
    """Largest lane-dense edge tile (multiple of 128, <= max_tile) that still
    yields a few grid steps (>=2 keeps both v7x TensorCores busy on the
    "parallel" axis; on v5e/v6e the bigger tile just amortizes per-step
    overhead).  Per-tile VMEM at max_tile=8192 is ~3 MiB — inside every
    chip's scoped default."""
    e_pad = _round_up(E, 128)
    if e_pad <= 128:
        return 128
    t = _round_up(-(-e_pad // target_steps), 128)
    t = min(max(t, 128), max_tile, e_pad)
    t = min(t, _round_up(-(-e_pad // 2), 128))   # guarantee >= 2 grid steps
    return t


def _make_kernel(F, d1, d2, d3, C, use_bf16_matmul):
    def mx(a):
        return a.astype(jnp.bfloat16) if use_bf16_matmul else a

    def kernel(x_ref, s_ref, p_ref, out_ref):
        # x_ref: [F, TE], s_ref: [1, TE], p_ref: [rows, F+d1+d2+C+4] packed,
        # out_ref: [C, TE].  Edges ride the 128-lane axis (lane-dense
        # loads/stores); tiny feature dims sit on sublanes.
        x = x_ref[...]                       # f32 [F, TE]
        s = s_ref[...]                       # f32 [1, TE]
        p = p_ref[...]                       # f32 packed params (static slices)

        c = 0
        w1t = p[:d1, c:c + F]; c += F        # [d1, F]
        b1 = p[:d1, c:c + 1]; c += 1         # [d1, 1]
        w2t = p[:d2, c:c + d1]; c += d1      # [d2, d1]
        b2 = p[:d2, c:c + 1]; c += 1         # [d2, 1]
        wf1t = p[:d3, c:c + d2]; c += d2     # [d3, d2]
        bf1 = p[:d3, c:c + 1]; c += 1        # [d3, 1]
        wf2 = p[:d3, c:c + C]; c += C        # [d3, C]
        bf2 = p[:C, c:c + 1]                 # [C, 1]

        # conv1 (LinkGCNConv).  The per-edge column scale s commutes with the
        # linear map, so for F == 1 fold it into x first: one [1,TE] VPU
        # multiply + broadcast instead of a [d1,TE] multiply; no MXU needed.
        if F == 1:
            sx = s * x                                   # [1, TE]
            h = jnp.maximum(w1t * sx + b1, 0.0)          # [d1, TE]
        else:
            h = jnp.dot(mx(w1t), mx(x), preferred_element_type=jnp.float32)
            h = jnp.maximum(s * h + b1, 0.0)
        # dropout: identity (eval mode)

        # conv2 (LinkGCNConv)
        h = jnp.dot(mx(w2t), mx(h), preferred_element_type=jnp.float32)
        h = jnp.maximum(s * h + b2, 0.0)
        # dropout: identity (eval mode)

        # fc1 + relu
        h = jnp.dot(mx(wf1t), mx(h), preferred_element_type=jnp.float32)
        h = jnp.maximum(h + bf1, 0.0)

        # fc2: C == 1 -> VPU multiply + sublane (XLU) reduction, skip the MXU.
        if C == 1:
            out = jnp.sum(wf2 * h, axis=0, keepdims=True)        # [1, TE]
        else:
            out = jax.lax.dot_general(
                mx(wf2), mx(h),
                dimension_numbers=(((0,), (0,)), ((), ())),
                preferred_element_type=jnp.float32)
        out_ref[...] = out + bf2

    return kernel


def netlgcn3_forward(x, s, params, *, tile_e=None, use_bf16_matmul=True,
                     lane_major_out=False):
    """x: [E, F] edge features, s: [E] (or [E,1]) GCN normalization sums.

    params: (w1, b1, w2, b2, wf1, bf1, wf2, bf2); weights stored [in, out]
    (PyTorch nn.Linear weights transposed once here), biases of shape [out].
    Returns [E, num_classes] (or [num_classes, E] if lane_major_out=True,
    which avoids a strided transpose when num_classes > 1).
    """
    E, F = x.shape
    w1, b1, w2, b2, wf1, bf1, wf2, bf2 = params
    d1, d2, d3 = w1.shape[1], w2.shape[1], wf1.shape[1]
    C = wf2.shape[1]

    if tile_e is None:
        tile_e = _pick_tile_e(E)

    # Edges on lanes.  x.T and s are separate lane-tiled inputs (no concat ->
    # no extra HBM round trip on the dominant stream).  For F == 1 the
    # transpose is just a reshape.
    xT = jnp.transpose(x).astype(jnp.float32)            # [F, E]
    s_row = jnp.reshape(s, (1, E)).astype(jnp.float32)   # [1, E]

    # Pack all 8 tiny weight/bias arrays into one resident f32 VMEM slab
    # (single small parameter stream instead of eight (8,128)-padded,
    # double-buffered ones).  Weights pre-transposed once, wrapper-side.
    def col(b):
        return jnp.reshape(b, (-1, 1))
    pieces = [jnp.transpose(w1), col(b1), jnp.transpose(w2), col(b2),
              jnp.transpose(wf1), col(bf1), wf2, col(bf2)]
    rows = max(d1, d2, d3, C)
    pieces = [jnp.pad(p.astype(jnp.float32), ((0, rows - p.shape[0]), (0, 0)))
              for p in pieces]
    p_slab = jnp.concatenate(pieces, axis=1)              # [rows, F+d1+d2+C+4]

    grid = (pl.cdiv(E, tile_e),)

    def lane_spec(r):
        # r equals the full (tiny) leading dim, so the (8,128) rule holds.
        return pl.BlockSpec((r, tile_e), lambda i: (0, i))

    kernel = _make_kernel(F, d1, d2, d3, C, use_bf16_matmul)

    flops = 2 * E * (F * d1 + d1 * d2 + d2 * d3 + d3 * C)
    bytes_accessed = 4 * (E * (F + 1 + C) + int(p_slab.size))

    out_t = pl.pallas_call(
        kernel,
        out_shape=jax.ShapeDtypeStruct((C, E), jnp.float32),
        grid=grid,
        in_specs=[
            lane_spec(F),                                   # x.T, tiled over edges
            lane_spec(1),                                   # s,   tiled over edges
            pl.BlockSpec(p_slab.shape, lambda i: (0, 0)),   # resident param slab
        ],
        out_specs=lane_spec(C),
        compiler_params=pltpu.CompilerParams(
            dimension_semantics=("parallel",)),
        cost_estimate=pl.CostEstimate(
            flops=flops, transcendentals=0, bytes_accessed=bytes_accessed),
    )(xT, s_row, p_slab)

    if lane_major_out:
        return out_t                     # [C, E]
    return jnp.transpose(out_t)          # [E, C]  (free reshape when C == 1)


def compute_gcn_scale(edge_neighbors, num_edges):
    """Replicates LinkGCNConv's normalization + the row-gather/row-scatter
    aggregation collapse: s[i] = sum_{e: row[e]==i} norm[e].
    Note: the original PyTorch code builds deg by scattering over `row`
    (scatter_add(edge_weight, row, ...)), which is reproduced here."""
    M = edge_neighbors.shape[1]
    edge_weight = jnp.ones((M,), jnp.float32)
    loops = jnp.arange(num_edges, dtype=edge_neighbors.dtype)
    row = jnp.concatenate([edge_neighbors[0], loops])
    col = jnp.concatenate([edge_neighbors[1], loops])
    w = jnp.concatenate([edge_weight, jnp.ones((num_edges,), jnp.float32)])
    deg = jax.ops.segment_sum(w, row, num_segments=num_edges)
    deg_inv = deg ** -0.5
    deg_inv = jnp.where(jnp.isinf(deg_inv), 0.0, deg_inv)
    norm = deg_inv[row] * w * deg_inv[col]
    s = jax.ops.segment_sum(norm, row, num_segments=num_edges)
    return s


def netlgcn3_reference(x, s, params):
    """Pure-JAX f32 reference of the collapsed forward pass."""
    w1, b1, w2, b2, wf1, bf1, wf2, bf2 = params
    sc = jnp.reshape(s, (-1, 1)).astype(jnp.float32)
    h = jnp.maximum(sc * (x @ w1) + b1, 0.0)
    h = jnp.maximum(sc * (h @ w2) + b2, 0.0)
    h = jnp.maximum(h @ wf1 + bf1, 0.0)
    return h @ wf2 + bf2


if __name__ == "__main__":
    key = jax.random.PRNGKey(0)
    E = 4096                    # number of edges ("links" carry the features)
    M = 8192                    # number of edge-neighbor pairs
    d1, d2, d3 = 16, 16, 10
    num_features, num_classes = 1, 1

    k = jax.random.split(key, 8)
    x = jax.random.normal(k[0], (E, num_features), jnp.float32)
    edge_neighbors = jax.random.randint(k[1], (2, M), 0, E, dtype=jnp.int32)

    def glorot(kk, shape):
        lim = (6.0 / (shape[0] + shape[1])) ** 0.5
        return jax.random.uniform(kk, shape, jnp.float32, -lim, lim)

    def linear_init(kw, kb, fan_in, fan_out):
        lim = 1.0 / (fan_in ** 0.5)
        w = jax.random.uniform(kw, (fan_in, fan_out), jnp.float32, -lim, lim)
        b = jax.random.uniform(kb, (fan_out,), jnp.float32, -lim, lim)
        return w, b

    # conv weights: glorot, conv biases: zeros (as in reset_parameters)
    w1 = glorot(k[2], (num_features, d1)); b1 = jnp.zeros((d1,), jnp.float32)
    w2 = glorot(k[3], (d1, d2));           b2 = jnp.zeros((d2,), jnp.float32)
    # fc layers: PyTorch-style uniform(-1/sqrt(fan_in), 1/sqrt(fan_in)), [in, out]
    wf1, bf1 = linear_init(k[4], k[5], d2, d3)
    wf2, bf2 = linear_init(k[6], k[7], d3, num_classes)

    params = (w1, b1, w2, b2, wf1, bf1, wf2, bf2)
    s = compute_gcn_scale(edge_neighbors, E)          # [E]

    out = netlgcn3_forward(x, s, params)              # tile_e auto (1024, 4 steps)
    jax.block_until_ready(out)

    assert out.shape == (E, num_classes)
    assert bool(jnp.all(jnp.isfinite(out)))

    ref = netlgcn3_reference(x, s, params)
    # bf16 matmul operands (f32 accumulation) -> loose-ish tolerance.
    assert bool(jnp.allclose(out, ref, rtol=5e-2, atol=5e-2)), (
        "kernel/reference mismatch: max abs err "
        f"{float(jnp.max(jnp.abs(out - ref)))}")
    print("KERNEL_OK")
</pallas_src>

<mosaic_0001>
module attributes {stable_mosaic.version = 11 : i64} {
  func.func @kernel(%arg0: i32, %arg1: memref<1x1024xf32, #tpu.memory_space<vmem>>, %arg2: memref<1x1024xf32, #tpu.memory_space<vmem>>, %arg3: memref<16x38xf32, #tpu.memory_space<vmem>>, %arg4: memref<1x1024xf32, #tpu.memory_space<vmem>>) attributes {dimension_semantics = [#tpu.dimension_semantics<parallel>], iteration_bounds = array<i64: 4>, scalar_prefetch = 0 : i64, scratch_operands = 0 : i64, tpu.core_type = #tpu.core_type<tc>, window_params = [{transform_indices = @transform_0, window_bounds = array<i64: 1, 1024>}, {transform_indices = @transform_1, window_bounds = array<i64: 1, 1024>}, {pipeline_mode = #tpu.pipeline_mode<synchronous>, transform_indices = @transform_2, window_bounds = array<i64: 16, 38>}, {transform_indices = @transform_3, window_bounds = array<i64: 1, 1024>}]} {
    %c0 = arith.constant 0 : index
    %c0_0 = arith.constant 0 : index
    %0 = vector.load %arg1[%c0, %c0_0] : memref<1x1024xf32, #tpu.memory_space<vmem>>, vector<1x1024xf32>
    %c0_1 = arith.constant 0 : index
    %c0_2 = arith.constant 0 : index
    %1 = vector.load %arg2[%c0_1, %c0_2] : memref<1x1024xf32, #tpu.memory_space<vmem>>, vector<1x1024xf32>
    %c0_3 = arith.constant 0 : index
    %c0_4 = arith.constant 0 : index
    %2 = vector.load %arg3[%c0_3, %c0_4] : memref<16x38xf32, #tpu.memory_space<vmem>>, vector<16x38xf32>
    %3 = vector.extract_strided_slice %2 {offsets = [0, 0], sizes = [16, 1], strides = [1, 1]} : vector<16x38xf32> to vector<16x1xf32>
    %4 = vector.extract_strided_slice %2 {offsets = [0, 1], sizes = [16, 1], strides = [1, 1]} : vector<16x38xf32> to vector<16x1xf32>
    %5 = vector.extract_strided_slice %2 {offsets = [0, 2], sizes = [16, 16], strides = [1, 1]} : vector<16x38xf32> to vector<16x16xf32>
    %6 = vector.extract_strided_slice %2 {offsets = [0, 18], sizes = [16, 1], strides = [1, 1]} : vector<16x38xf32> to vector<16x1xf32>
    %7 = vector.extract_strided_slice %2 {offsets = [0, 19], sizes = [10, 16], strides = [1, 1]} : vector<16x38xf32> to vector<10x16xf32>
    %8 = vector.extract_strided_slice %2 {offsets = [0, 35], sizes = [10, 1], strides = [1, 1]} : vector<16x38xf32> to vector<10x1xf32>
    %9 = vector.extract_strided_slice %2 {offsets = [0, 36], sizes = [10, 1], strides = [1, 1]} : vector<16x38xf32> to vector<10x1xf32>
    %10 = vector.extract_strided_slice %2 {offsets = [0, 37], sizes = [1, 1], strides = [1, 1]} : vector<16x38xf32> to vector<1x1xf32>
    %11 = arith.mulf %1, %0 : vector<1x1024xf32>
    %12 = vector.broadcast %3 : vector<16x1xf32> to vector<16x1024xf32>
    %13 = vector.broadcast %11 : vector<1x1024xf32> to vector<16x1024xf32>
    %14 = arith.mulf %12, %13 : vector<16x1024xf32>
    %15 = vector.broadcast %4 : vector<16x1xf32> to vector<16x1024xf32>
    %16 = arith.addf %14, %15 : vector<16x1024xf32>
    %cst = arith.constant 0.000000e+00 : f32
    %17 = vector.broadcast %cst : f32 to vector<16x1024xf32>
    %18 = arith.maximumf %16, %17 : vector<16x1024xf32>
    %19 = arith.truncf %5 : vector<16x16xf32> to vector<16x16xbf16>
    %20 = arith.truncf %18 : vector<16x1024xf32> to vector<16x1024xbf16>
    %cst_5 = arith.constant dense<0.000000e+00> : vector<16x1024xf32>
    %21 = tpu.matmul %19, %20, %cst_5 {dimension_numbers = #tpu.dot_dimension_numbers<[1], [0], [0], [1], [0, 0, 1, 1], [], []>} : vector<16x16xbf16>, vector<16x1024xbf16>, vector<16x1024xf32> -> vector<16x1024xf32>
    %22 = vector.broadcast %1 : vector<1x1024xf32> to vector<16x1024xf32>
    %23 = arith.mulf %22, %21 : vector<16x1024xf32>
    %24 = vector.broadcast %6 : vector<16x1xf32> to vector<16x1024xf32>
    %25 = arith.addf %23, %24 : vector<16x1024xf32>
    %cst_6 = arith.constant 0.000000e+00 : f32
    %26 = vector.broadcast %cst_6 : f32 to vector<16x1024xf32>
    %27 = arith.maximumf %25, %26 : vector<16x1024xf32>
    %28 = arith.truncf %7 : vector<10x16xf32> to vector<10x16xbf16>
    %29 = arith.truncf %27 : vector<16x1024xf32> to vector<16x1024xbf16>
    %cst_7 = arith.constant dense<0.000000e+00> : vector<10x1024xf32>
    %30 = tpu.matmul %28, %29, %cst_7 {dimension_numbers = #tpu.dot_dimension_numbers<[1], [0], [0], [1], [0, 0, 1, 1], [], []>} : vector<10x16xbf16>, vector<16x1024xbf16>, vector<10x1024xf32> -> vector<10x1024xf32>
    %31 = vector.broadcast %8 : vector<10x1xf32> to vector<10x1024xf32>
    %32 = arith.addf %30, %31 : vector<10x1024xf32>
    %cst_8 = arith.constant 0.000000e+00 : f32
    %33 = vector.broadcast %cst_8 : f32 to vector<10x1024xf32>
    %34 = arith.maximumf %32, %33 : vector<10x1024xf32>
    %35 = vector.broadcast %9 : vector<10x1xf32> to vector<10x1024xf32>
    %36 = arith.mulf %35, %34 : vector<10x1024xf32>
    %cst_9 = arith.constant dense<0.000000e+00> : vector<1024xf32>
    %37 = vector.multi_reduction <add>, %36, %cst_9 [0] : vector<10x1024xf32> to vector<1024xf32>
    %38 = vector.shape_cast %37 : vector<1024xf32> to vector<1x1024xf32>
    %39 = vector.broadcast %10 : vector<1x1xf32> to vector<1x1024xf32>
    %40 = arith.addf %38, %39 : vector<1x1024xf32>
    %c0_10 = arith.constant 0 : index
    %c0_11 = arith.constant 0 : index
    %41 = vector.load %arg4[%c0_10, %c0_11] : memref<1x1024xf32, #tpu.memory_space<vmem>>, vector<1x1024xf32>
    tpu.vector_store %arg4[%c0_10, %c0_11], %40 {strides = array<i32>} : memref<1x1024xf32, #tpu.memory_space<vmem>>, vector<1x1024xf32>,
    return
  }
  func.func @transform_0(%arg0: i32) -> (i32, i32) {
    %c0_i32 = arith.constant 0 : i32
    %c0_i32_0 = arith.constant 0 : i32
    return %c0_i32, %arg0 : i32, i32
  }
  func.func @transform_1(%arg0: i32) -> (i32, i32) {
    %c0_i32 = arith.constant 0 : i32
    %c0_i32_0 = arith.constant 0 : i32
    return %c0_i32, %arg0 : i32, i32
  }
  func.func @transform_2(%arg0: i32) -> (i32, i32) {
    %c0_i32 = arith.constant 0 : i32
    %c0_i32_0 = arith.constant 0 : i32
    %c0_i32_1 = arith.constant 0 : i32
    return %c0_i32, %c0_i32_0 : i32, i32
  }
  func.func @transform_3(%arg0: i32) -> (i32, i32) {
    %c0_i32 = arith.constant 0 : i32
    %c0_i32_0 = arith.constant 0 : i32
    return %c0_i32, %arg0 : i32, i32
  }
}

</mosaic_0001>

<bundles_post_ra>
// kernel: tpu_custom_call.1
= control target key start
LH: loop header
LB: loop body
LE: loop exit
PB: predicated region body
PF: predicated region fallthrough
CT: control target
= control target key end

     0   :  { %8 = vsyncpa [#allocation3], 0  ;;  %s1808_s0 = inlined_call_operand.hbm [shape: f32[1,4096], index: 0, kind: input, shape index: {}]   ;;  %s1809_s1 = inlined_call_operand.hbm [shape: f32[1,4096], index: 1, kind: input, shape index: {}]   ;;  %s1810_s2 = inlined_call_operand.hbm [shape: f32[16,38], index: 2, kind: input, shape index: {}]   ;;  %s1811_s3 = inlined_call_operand.hbm [shape: f32[1,4096], index: 3, kind: output, shape index: {}]  }
   0x1   :  { %10 = vsyncpa [#allocation3 + $0x1], 0 }
   0x2   :  { %11 = vsyncpa [#allocation6], 0 }
   0x3   :  { %13 = vsyncpa [#allocation6 + $0x1], 0 }
   0x4   :  { %14 = vsyncpa [#allocation4], 0 }
   0x5   :  { %16 = vsyncpa [#allocation4 + $0x1], 0  ;;  %s1437_s12 = smov 0   ;;  %s1439_s13 = smov 0  }
   0x6   :  { %s1441_s14 = smov 0   ;;  %s1443_s15 = smov 0  }
   0x7 LB: > { %s1458_s16 = sadd.s32 4294967295, %s1400_s15   ;;  %s1126_s17 = sadd.s32 4294967294, %s1400_s15   ;;  %s1400_s15 = sphi %s1443_s15, %s1832_s15   ;;  %s1396_s14 = sphi %s1441_s14, %s1831_s14   ;;  %s1392_s13 = sphi %s1439_s13, %s1830_s13   ;;  %s1388_s12 = sphi %s1437_s12, %s1829_s12  }
   0x8   : > { %p42_p0 = scmp.ne.s32.totalorder %s1392_s13, %s1388_s12  ;;  %p1812_p1 = scmp.eq.s32.totalorder %s1458_s16, 0 }
   0x9   : > { %p119_p3 = scmp.eq.s32.totalorder %s1126_s17, 3  ;;  %p1127_p5 = scmp.ge.s32.totalorder %s1400_s15, 1 }
   0xa   : > { %p1467_p4 = por %p1812_p1, %p42_p0  ;;  %p126_p7 = scmp.lt.s32.totalorder %s1400_s15, 5 }
   0xb   : > { %p1472_p6 = por %p119_p3, %p42_p0  ;;  %s1402_s21 = smov [#allocation7]  }
   0xc   : > { %s1816_s18 = scalar_select %p1467_p4, 1, 0 }
   0xd   : > { %s1817_s19 = scalar_select %p1472_p6, 1, 0 }
   0xe   : > { %p1477_p8 = pnand %p1127_p5, %p126_p7  ;;  %s138_s22 = sshll.u32 %s1402_s21, 4  ;;  %s139_s22 = int_to_ptr.vmem [resolvable:$true] %s138_s22 }
   0xf   : > { %s1490_s24 = sadd.s32 1, %s1400_s15   ;;  %s29_s25 = sadd.s32 1, %s1396_s14 }
  0x10   : > { %s1818_s20 = scalar_select %p1477_p8, 1, 0 }
  0x11   : > { %p1167_p9 = pneg %p1477_p8  ;;  %s26_s26 = ssub.s32 %s1400_s15, %s1490_s24 }
  0x12   : > { %s1238_s29 = scalar_lea.hbm %s1810_s2, 256 }
  0x13   : > { %p1485_p10 = pnand %p1167_p9, %p1812_p1  ;;  %p1239_p11 = scmp.ne.s32.totalorder %s1810_s2, %s1238_s29 }
  0x14   : > { %p1245_p3 = scmp.lt.u32.totalorder %s1238_s29, %s1810_s2 }
  0x15   : > { %p1240_p12 = pneg %p1485_p10 }
  0x17   : > { %p1241_p13 = pnand %p1240_p12, %p1239_p11 }
  0x19   : > { %p1242_p0 = pneg %p1241_p13 }
  0x1b   : > { %p1247_p5 = pnand %p1245_p3, %p1242_p0 }
  0x1d   : > { %1250 = shalt.err (!%p1247_p5)
}
  0x1e   : > { %s1251_s7 = scalar_lea.vmem %s139_s22, 256  ;;  %p1259_p2 = scmp.lt.s32.totalorder %s139_s22, %s139_s22 }
  0x1f   : > { %p1252_p7 = scmp.ne.s32.totalorder %s139_s22, %s1251_s7  ;;  %p1260_p6 = scmp.lt.s32.totalorder %s1251_s7, %s1251_s7 }
  0x21   : > { %p1254_p9 = pnand %p1252_p7, %p1240_p12  ;;  %p1261_p4 = por %p1260_p6, %p1259_p2 }
  0x23   : > { %p1255_p1 = pneg %p1254_p9 }
  0x25   : > { %p1262_p8 = pnand %p1261_p4, %p1255_p1 }
  0x27   : > { %1265 = shalt.err (!%p1262_p8)
}
  0x28   : > { %s1403_s8 = smov 128   ;;  %s1404_s9 = smov 8  }
  0x29   : > { %1170 = dma.hbm_to_vmem [thread:$0]  (!%p1485_p10), %s1810_s2, 256, %s139_s22, [#allocation6], %s1403_s8, %s1403_s8, %s1404_s9  }
  0x2a   : > { %p27_p11 = scmp.eq.s32.totalorder %s26_s26, 0  ;;  %p36_p2 = scmp.ne.s32.totalorder %s1396_s14, %s1392_s13 }
  0x2b   : > { %p37_p1 = scmp.eq.s32.totalorder %s1400_s15, 0  ;;  %p1183_p4 = scmp.lt.s32.totalorder %s1400_s15, 4 }
  0x2c   : > { %s1516_s17 = scalar_select %p27_p11, %s1396_s14, %s29_s25  }
  0x2d   : > { %p38_p6 = por %p37_p1, %p36_p2  ;;  %p1820_p8 = scmp.eq.s32.totalorder %s1458_s16, 3 }
  0x2e   : > { %s152_s27 = sand.u32 1, %s1396_s14   ;;  %s1154_s28 = sshll.u32 %s1400_s15, 7 }
  0x2f   : > { %p1520_p12 = por %p1820_p8, %p36_p2  ;;  %s1526_s29 = sshll.u32 %s152_s27, 3 }
  0x30   : > { %s1531_s22 = scalar_lea.hbm %s1808_s0, %s1154_s28  ;;  %s156_s25 = scalar_lea.vmem [#allocation2], %s1526_s29 }
  0x31   : > { %s1821_s21 = scalar_select %p1520_p12, 1, 0 }
  0x32   : > { %s164_s26 = sshll.u32 %s156_s25, 4  ;;  %p1534_p10 = pnand %p1183_p4, %p38_p6  ;;  %s1538_s26 = int_to_ptr.vmem [resolvable:$true] %s164_s26 }
  0x33   : > { %s1543_s7 = scalar_lea.hbm %s1809_s1, %s1154_s28  ;;  %s153_s8 = scalar_lea.sflag [#allocation3], %s152_s27 }
  0x34   : > { %s1266_s9 = scalar_lea.hbm %s1531_s22, 128  ;;  %p1268_p0 = pneg %p1534_p10 }
  0x35   : > { %p1267_p13 = scmp.ne.s32.totalorder %s1531_s22, %s1266_s9  ;;  %s1271_s23 = scalar_lea.hbm %s1808_s0, 512 }
  0x36   : > { %p1272_p7 = scmp.lt.u32.totalorder %s1531_s22, %s1808_s0  ;;  %p1273_p9 = scmp.lt.u32.totalorder %s1271_s23, %s1266_s9 }
  0x37   : > { %p1269_p3 = pnand %p1268_p0, %p1267_p13  ;;  %p1275_p2 = scmp.lt.u32.totalorder %s1266_s9, %s1531_s22 }
  0x38   : > { %p1274_p11 = por %p1273_p9, %p1272_p7 }
  0x39   : > { %p1270_p5 = pneg %p1269_p3 }
  0x3a   : > { %p1276_p1 = por %p1275_p2, %p1274_p11 }
  0x3c   : > { %p1277_p4 = pnand %p1276_p1, %p1270_p5 }
  0x3e   : > { %1280 = shalt.err (!%p1277_p4)
}
  0x3f   : > { %s1281_s27 = scalar_lea.vmem %s1538_s26, 128  ;;  %s1405_s28 = smov [#allocation2]  }
  0x40   : > { %p1282_p6 = scmp.ne.s32.totalorder %s1538_s26, %s1281_s27  ;;  %s1286_s5 = sshll.u32 %s1405_s28, 4  ;;  %s1287_s5 = int_to_ptr.vmem [resolvable:$false] %s1286_s5 }
  0x41   : > { %s1288_s6 = scalar_lea.vmem %s1287_s5, 256  ;;  %p1289_p3 = scmp.lt.s32.totalorder %s1538_s26, %s1287_s5 }
  0x42   : > { %p1284_p8 = pnand %p1282_p6, %p1268_p0  ;;  %p1290_p7 = scmp.lt.s32.totalorder %s1288_s6, %s1281_s27 }
  0x44   : > { %p1285_p13 = pneg %p1284_p8  ;;  %p1291_p9 = por %p1290_p7, %p1289_p3 }
  0x46   : > { %p1292_p11 = pnand %p1291_p9, %p1285_p13 }
  0x48   : > { %1295 = shalt.err (!%p1292_p11)
}
  0x49   : > { %1174 = dma.hbm_to_vmem [thread:$0]  (!%p1534_p10), %s1531_s22, 128, %s1538_s26, %s153_s8  }
  0x4a   : > { %s171_s9 = sand.u32 1, %s1400_s15   ;;  %s175_s10 = scalar_lea.vmem [#allocation5], %s1526_s29 }
  0x4b   : > { %s183_s11 = sshll.u32 %s175_s10, 4  ;;  %s172_s23 = scalar_lea.sflag [#allocation6], %s171_s9  ;;  %s184_s11 = int_to_ptr.vmem [resolvable:$true] %s183_s11 }
  0x4c   : > { %s1296_s30 = scalar_lea.hbm %s1543_s7, 128  ;;  %s1301_s28 = scalar_lea.hbm %s1809_s1, 512 }
  0x4d   : > { %p1297_p5 = scmp.ne.s32.totalorder %s1543_s7, %s1296_s30  ;;  %p1302_p4 = scmp.lt.u32.totalorder %s1543_s7, %s1809_s1 }
  0x4e   : > { %p1303_p6 = scmp.lt.u32.totalorder %s1301_s28, %s1296_s30  ;;  %p1305_p13 = scmp.lt.u32.totalorder %s1296_s30, %s1543_s7 }
  0x4f   : > { %p1299_p2 = pnand %p1297_p5, %p1268_p0 }
  0x50   : > { %p1304_p8 = por %p1303_p6, %p1302_p4 }
  0x51   : > { %p1300_p1 = pneg %p1299_p2 }
  0x52   : > { %p1306_p3 = por %p1305_p13, %p1304_p8 }
  0x54   : > { %p1307_p7 = pnand %p1306_p3, %p1300_p1 }
  0x56   : > { %1310 = shalt.err (!%p1307_p7)
}
  0x57   : > { %s1311_s29 = scalar_lea.vmem %s184_s11, 128  ;;  %s1406_s22 = smov [#allocation5]  }
  0x58   : > { %p1312_p9 = scmp.ne.s32.totalorder %s184_s11, %s1311_s29  ;;  %s1316_s26 = sshll.u32 %s1406_s22, 4  ;;  %s1317_s26 = int_to_ptr.vmem [resolvable:$false] %s1316_s26 }
  0x59   : > { %s1318_s8 = scalar_lea.vmem %s1317_s26, 256  ;;  %p1319_p2 = scmp.lt.s32.totalorder %s184_s11, %s1317_s26 }
  0x5a   : > { %p1314_p11 = pnand %p1312_p9, %p1268_p0  ;;  %p1320_p12 = scmp.lt.s32.totalorder %s1318_s8, %s1311_s29 }
  0x5c   : > { %p1315_p5 = pneg %p1314_p11  ;;  %p1321_p4 = por %p1320_p12, %p1319_p2 }
  0x5e   : > { %p1322_p6 = pnand %p1321_p4, %p1315_p5 }
  0x60   : > { %1325 = shalt.err (!%p1322_p6)
}
  0x61   : > { %1177 = dma.hbm_to_vmem [thread:$0]  (!%p1534_p10), %s1543_s7, 128, %s184_s11, %s172_s23  }
  0x62   : > { %p1823_p1 = scmp.ne.s32.totalorder %s1818_s20, 0 }
  0x63   : > { %s1594_s9 = sand.u32 (!%p1823_p1), 1, %s1392_s13   ;;  %p1824_p12 = scmp.ne.s32.totalorder (!%p1823_p1), %s1816_s18, 0 }
  0x64   : > { %192 = sbr.rel (%p1823_p1) target bundleno = 763 (0x2fb), region = 32  ;;  %s1597_s10 = sshll.u32 (!%p1823_p1), %s1594_s9, 3 }
  0x65   : > { %s195_s30 = scalar_lea.sflag (!%p1823_p1), [#allocation3], %s1594_s9  ;;  %s198_s25 = scalar_lea.vmem (!%p1823_p1), [#allocation2], %s1597_s10 }
  0x6b   : > { %1371 = dma.done.wait (%p1824_p12), %s195_s30, 128  }
  0x6c   : > { %1373 = vsyncadd (%p1824_p12), %s195_s30, 4294967168  ;;  %s203_s20 = sand.u32 1, %s1458_s16   ;;  %s207_s7 = scalar_lea.vmem [#allocation5], %s1597_s10 }
  0x6d   : > { %s204_s4 = scalar_lea.sflag [#allocation6], %s203_s20 }
  0x6e   : > { %1375 = dma.done.wait (%p1824_p12), %s204_s4, 128  }
  0x6f   : > { %1377 = vsyncadd (%p1824_p12), %s204_s4, 4294967168  ;;  %p1825_p10 = scmp.eq.s32.totalorder %s1458_s16, 0 }
  0x71   : > { %1379 = dma.done.wait (%p1825_p10), [#allocation6], 256   ;;  %p1826_p0 = pmov %p1825_p10 }
  0x72   : > { %v1407_v0 = vmov 1   ;;  %v1408_v1 = vmov 0   ;;  %v1618_v2 = vld [vmem:[#allocation7] sm:$0xff]  ;;  %v1622_v3 = vld [vmem:[#allocation7 + $0x8] sm:$0xff]  ;;  %s1409_s18 = smov 126   ;;  %v1410_v5 = vmov 18   ;;  %v259_v6 = vlaneseq }
  0x73   : > { %1381 = vsyncadd (%p1826_p0), [#allocation6], 4294967040  ;;  %1231 = vset.pattern.permute.xlu1 %v1407_v0  ;;  %1230 = vset.pattern.permute.xlu0 %v1408_v1  ;;  %v355_v4 = vpack.c.bf16 %v1622_v3, %v1618_v2  ;;  %s1411_s11 = smov 109   ;;  %v243_v8 = vld [vmem:[%s198_s25] sm:$0xff]  ;;  %v1636_v9 = vld [vmem:[%s207_s7] sm:$0xff]  ;;  %vm367_vm0 = vcmask 130048  }
  0x74   : > { %403 = vmatprep.mubr.bf16.mxu0 %v1408_v1  ;;  %446 = vmatprep.mubr.bf16.mxu1 %v1408_v1  ;;  %v1630_v7 = vshrl.u32 %v259_v6, 7  ;;  %v247_v11 = vmul.f32 %v1636_v9, %v243_v8  ;;  %vm873_vm1 = vcmask 1041408   ;;  %s1156_s23 = sshll.u32 %s1458_s16, 7  ;;  %s238_s27 = scalar_lea.vmem [#allocation8], %s1597_s10 }
  0x75   : > { %316 = vperm.xlu1 %1231, %v1618_v2   ;;  %250 = vperm.xlu0 %1230, %v1618_v2   ;;  %s1024_s28 = sshll.u32 %s238_s27, 4  ;;  %s1765_s29 = scalar_lea.hbm %s1811_s3, %s1156_s23  ;;  %s1767_s28 = int_to_ptr.vmem [resolvable:$true] %s1024_s28 }
  0x76   : > { %v265_v10 = vsub.s32 1, %v1630_v7  ;;  %v273_v12 = vsub.s32 3, %v1630_v7  ;;  %v261_v13 = vsub.s32 0, %v1630_v7  ;;  %v269_v14 = vsub.s32 2, %v1630_v7  ;;  %s1010_s22 = scalar_lea.sflag [#allocation4], %s1594_s9  ;;  %s1326_s26 = scalar_lea.vmem %s1767_s28, 128 }
  0x77   : > { %v281_v15 = vsub.s32 5, %v1630_v7  ;;  %v289_v16 = vsub.s32 7, %v1630_v7  ;;  %v277_v17 = vsub.s32 4, %v1630_v7  ;;  %v285_v18 = vsub.s32 6, %v1630_v7  ;;  %p1327_p8 = scmp.ne.s32.totalorder %s1767_s28, %s1326_s26  ;;  %p1827_p13 = scmp.ne.s32.totalorder %s1821_s21, 0 }
  0x78   : > { %v266_v19 = vrot.slane %v247_v11, %v265_v10  ;;  %v274_v20 = vrot.slane %v247_v11, %v273_v12  ;;  %v262_v21 = vrot.slane %v247_v11, %v261_v13  ;;  %v270_v22 = vrot.slane %v247_v11, %v269_v14  ;;  %s1416_s16 = smov [#allocation8]  }
  0x79   : > { %320 = vperm.xlu1 %1231, %v1622_v3   ;;  %255 = vperm.xlu0 %1230, %v1622_v3   ;;  %v282_v23 = vrot.slane %v247_v11, %v281_v15  ;;  %v290_v24 = vrot.slane %v247_v11, %v289_v16  ;;  %v278_v25 = vrot.slane %v247_v11, %v277_v17  ;;  %p1328_p3 = pnand %p1327_p8, %p1827_p13  ;;  %s1330_s8 = sshll.u32 %s1416_s16, 4  ;;  %s1331_s8 = int_to_ptr.vmem [resolvable:$false] %s1330_s8 }
  0x7a   : > { %v286_v26 = vrot.slane %v247_v11, %v285_v18  ;;  %s1332_s10 = scalar_lea.vmem %s1331_s8, 256  ;;  %p1333_p9 = scmp.lt.s32.totalorder %s1767_s28, %s1331_s8 }
  0x7b   : > { %p1329_p7 = pneg %p1328_p3  ;;  %p1334_p11 = scmp.lt.s32.totalorder %s1332_s10, %s1326_s26 }
  0x7d   : > { %365 = vrot.lane.b32.xlu0 %v355_v4, %s1409_s18  ;;  %1232 = vset.pattern.permute.xlu1 %v1410_v5  ;;  %p1335_p5 = por %p1334_p11, %p1333_p9 }
  0x7e   : > { %1233 = vset.pattern.permute.xlu0 %v1410_v5  ;;  %601 = vperm.xlu1 %1232, %v1618_v2  }
  0x7f   : > { %p1336_p2 = pnand %p1335_p5, %p1329_p7 }
  0x81   : > { %605 = vperm.xlu0 %1233, %v1622_v3  }
  0x82   : > { %656 = vrot.lane.b32.xlu1 %v355_v4, %s1411_s11 }
  0xf4   : > { %v317_v27 = vpop.permute.xlu1 %316  ;;  %v251_v28 = vpop.permute.xlu0 %250 }
  0xf5   : > { %v300_v29 = vmul.f32 %v266_v19, %v251_v28  ;;  %v302_v30 = vmul.f32 %v274_v20, %v251_v28  ;;  %v299_v31 = vmul.f32 %v262_v21, %v251_v28  ;;  %v301_v32 = vmul.f32 %v270_v22, %v251_v28 }
  0xf6   : > { %v304_v33 = vmul.f32 %v282_v23, %v251_v28  ;;  %v306_v34 = vmul.f32 %v290_v24, %v251_v28  ;;  %v303_v35 = vmul.f32 %v278_v25, %v251_v28  ;;  %v305_v36 = vmul.f32 %v286_v26, %v251_v28 }
  0xf7   : > { %v324_v37 = vadd.f32 %v317_v27, %v300_v29  ;;  %v326_v38 = vadd.f32 %v317_v27, %v302_v30  ;;  %v323_v39 = vadd.f32 %v317_v27, %v299_v31  ;;  %v325_v40 = vadd.f32 %v317_v27, %v301_v32 }
  0xf8   : > { %v256_v41 = vpop.permute.xlu0 %255  ;;  %v328_v42 = vadd.f32 %v317_v27, %v304_v33  ;;  %v330_v43 = vadd.f32 %v317_v27, %v306_v34  ;;  %v327_v44 = vadd.f32 %v317_v27, %v303_v35  ;;  %v329_v48 = vadd.f32 %v317_v27, %v305_v36  ;;  %v321_v49 = vpop.permute.xlu1 %320 }
  0xf9   : > { %v308_v45 = vmul.f32 %v266_v19, %v256_v41  ;;  %v340_v46 = vmax.f32 %v324_v37, 0.0  ;;  %v310_v47 = vmul.f32 %v274_v20, %v256_v41  ;;  %v342_v50 = vmax.f32 %v326_v38, 0.0 }
  0xfa   : > { %v307_v51 = vmul.f32 %v262_v21, %v256_v41  ;;  %v339_v52 = vmax.f32 %v323_v39, 0.0  ;;  %v309_v53 = vmul.f32 %v270_v22, %v256_v41  ;;  %v341_v56 = vmax.f32 %v325_v40, 0.0 }
  0xfb   : > { %v332_v54 = vadd.f32 %v321_v49, %v308_v45  ;;  %v334_v55 = vadd.f32 %v321_v49, %v310_v47  ;;  %v312_v57 = vmul.f32 %v282_v23, %v256_v41  ;;  %v344_v60 = vmax.f32 %v328_v42, 0.0 }
  0xfc   : > { %v331_v58 = vadd.f32 %v321_v49, %v307_v51  ;;  %v333_v59 = vadd.f32 %v321_v49, %v309_v53  ;;  %v314_v61 = vmul.f32 %v290_v24, %v256_v41  ;;  %v311_v4 = vmul.f32 %v278_v25, %v256_v41  ;;  %v366_v25 = vpop.permute.xlu0 %365 }
  0xfd   : > { %v348_v62 = vmax.f32 %v332_v54, 0.0  ;;  %v350_v63 = vmax.f32 %v334_v55, 0.0  ;;  %v336_v0 = vadd.f32 %v321_v49, %v312_v57  ;;  %v346_v11 = vmax.f32 %v330_v43, 0.0  ;;  %v602_v43 = vpop.permute.xlu1 %601 }
  0xfe   : > { %v347_v5 = vmax.f32 %v331_v58, 0.0  ;;  %v349_v6 = vmax.f32 %v333_v59, 0.0  ;;  %v338_v8 = vadd.f32 %v321_v49, %v314_v61  ;;  %v335_v22 = vadd.f32 %v321_v49, %v311_v4 }
  0xff   : > { %v357_v19 = vpack.c.bf16 %v348_v62, %v340_v46  ;;  %v359_v20 = vpack.c.bf16 %v350_v63, %v342_v50  ;;  %v352_v21 = vmax.f32 %v336_v0, 0.0  ;;  %v313_v23 = vmul.f32 %v286_v26, %v256_v41 }
 0x100   : > { %v356_v27 = vpack.c.bf16 %v347_v5, %v339_v52  ;;  %v358_v28 = vpack.c.bf16 %v349_v6, %v341_v56  ;;  %v354_v29 = vmax.f32 %v338_v8, 0.0  ;;  %v351_v24 = vmax.f32 %v335_v22, 0.0 }
 0x101   : > { %371 = vmatprep.subr.bf16.mxu0 %v357_v19  ;;  %414 = vmatprep.subr.bf16.mxu1 %v359_v20  ;;  %v361_v30 = vpack.c.bf16 %v352_v21, %v344_v60  ;;  %v343_v32 = vmax.f32 %v327_v44, 0.0  ;;  %v337_v33 = vadd.f32 %v321_v49, %v313_v23  ;;  %v345_v35 = vmax.f32 %v329_v48, 0.0  ;;  %v1688_v44 = vpop.permute.xlu0 %605 }
 0x102   : > { %372 = vmatpush1.bf16.msra.mxu0 %v356_v27  ;;  %415 = vmatpush1.bf16.msra.mxu1 %v358_v28  ;;  %v363_v31 = vpack.c.bf16 %v354_v29, %v346_v11  ;;  %v1412_v37 = vmov 35   ;;  %v1413_v38 = vmov 36   ;;  %v1414_v39 = vmov 37  }
 0x103   : > { %457 = vmatprep.subr.bf16.mxu0 %v361_v30  ;;  %v360_v34 = vpack.c.bf16 %v351_v24, %v343_v32  ;;  %v353_v36 = vmax.f32 %v337_v33, 0.0  ;;  %1234 = vset.pattern.permute.xlu1 %v1412_v37  ;;  %v547_v40 = vrot.slane %v1636_v9, %v261_v13  ;;  %v555_v41 = vrot.slane %v1636_v9, %v269_v14 }
 0x104   : > { %500 = vmatprep.subr.bf16.mxu1 %v363_v31  ;;  %1235 = vset.pattern.permute.xlu0 %v1412_v37  ;;  %v551_v42 = vrot.slane %v1636_v9, %v265_v10  ;;  %v563_v60 = vrot.slane %v1636_v9, %v277_v17  ;;  %v571_v61 = vrot.slane %v1636_v9, %v285_v18 }
 0x105   : > { %1141 = vmatmul.mubr.msk.bf16.vlgmr.msra.gmra.mrb[0].mxu0 %vm367_vm0, %v366_v25  ;;  %1142 = vmatmul.mubr.msk.bf16.vlgmr.msra.gmra.mrb[0].mxu1 %vm367_vm0, %v366_v25  ;;  %v362_v26 = vpack.c.bf16 %v353_v36, %v345_v35  ;;  %v567_v0 = vrot.slane %v1636_v9, %v281_v15  ;;  %v575_v4 = vrot.slane %v1636_v9, %v289_v16 }
 0x106   : > { %458 = vmatpush1.bf16.msra.mxu0 %v360_v34  ;;  %489 = vmatprep.mubr.bf16.mxu0 %v1408_v1 }
 0x107   : > { %532 = vmatprep.mubr.bf16.mxu1 %v1408_v1  ;;  %501 = vmatpush1.bf16.msra.mxu1 %v362_v26 }
 0x108   : > { %653 = vperm.xlu1 %1234, %v1622_v3   ;;  %649 = vperm.xlu0 %1235, %v1618_v2  }
 0x10c   : > { %1236 = vset.pattern.permute.xlu1 %v1413_v38  ;;  %1237 = vset.pattern.permute.xlu0 %v1414_v39 }
 0x10d   : > { %1143 = vmatmul.mubr.msk.bf16.vlgmr.msra.gmra.mrb[4].mxu0 %vm367_vm0, %v366_v25  ;;  %1144 = vmatmul.mubr.msk.bf16.vlgmr.msra.gmra.mrb[4].mxu1 %vm367_vm0, %v366_v25 }
 0x10e   : > { %693 = vmatprep.mubr.bf16.mxu0 %v1408_v1  ;;  %736 = vmatprep.mubr.bf16.mxu1 %v1408_v1 }
 0x10f   : > { %854 = vperm.xlu1 %1236, %v1622_v3   ;;  %939 = vperm.xlu0 %1237, %v1618_v2   ;;  %v559_v3 = vrot.slane %v1636_v9, %v273_v12 }
 0x113   : > { %850 = vperm.xlu1 %1236, %v1618_v2  }
 0x1d8   : > { %v405_v2 = vpop.f32.mrb[0].mxu0  ;;  %v448_v45 = vpop.f32.mrb[0].mxu1 }
 0x1d9   : > { %v584_v46 = vmul.f32 %v547_v40, %v405_v2  ;;  %v586_v47 = vmul.f32 %v555_v41, %v448_v45  ;;  %v407_v13 = vpop.f32.mrb[1].mxu0  ;;  %v450_v48 = vpop.f32.mrb[1].mxu1 }
 0x1da   : > { %v585_v49 = vmul.f32 %v551_v42, %v407_v13  ;;  %v587_v50 = vmul.f32 %v559_v3, %v450_v48  ;;  %v409_v14 = vpop.f32.mrb[2].mxu0  ;;  %v452_v51 = vpop.f32.mrb[2].mxu1 }
 0x1db   : > { %v592_v52 = vmul.f32 %v547_v40, %v409_v14  ;;  %v594_v53 = vmul.f32 %v555_v41, %v452_v51  ;;  %v411_v10 = vpop.f32.mrb[3].mxu0  ;;  %v454_v54 = vpop.f32.mrb[3].mxu1  ;;  %v608_v55 = vadd.f32 %v602_v43, %v584_v46  ;;  %v610_v56 = vadd.f32 %v602_v43, %v586_v47 }
 0x1dc   : > { %v593_v12 = vmul.f32 %v551_v42, %v411_v10  ;;  %v595_v57 = vmul.f32 %v559_v3, %v454_v54  ;;  %v609_v58 = vadd.f32 %v602_v43, %v585_v49  ;;  %v611_v59 = vadd.f32 %v602_v43, %v587_v50  ;;  %v657_v46 = vpop.permute.xlu1 %656 }
 0x1dd   : > { %v616_v62 = vadd.f32 %v1688_v44, %v592_v52  ;;  %v618_v63 = vadd.f32 %v1688_v44, %v594_v53  ;;  %v624_v6 = vmax.f32 %v608_v55, 0.0  ;;  %v626_v11 = vmax.f32 %v610_v56, 0.0 }
 0x1de   : > { %v617_v5 = vadd.f32 %v1688_v44, %v593_v12  ;;  %v619_v17 = vadd.f32 %v1688_v44, %v595_v57  ;;  %v625_v21 = vmax.f32 %v609_v58, 0.0  ;;  %v627_v27 = vmax.f32 %v611_v59, 0.0  ;;  %v1720_v57 = vpop.permute.xlu0 %649 }
 0x1df   : > { %v632_v8 = vmax.f32 %v616_v62, 0.0  ;;  %v634_v18 = vmax.f32 %v618_v63, 0.0 }
 0x1e0   : > { %v491_v19 = vpop.f32.mrb[4].mxu0  ;;  %v534_v20 = vpop.f32.mrb[4].mxu1  ;;  %v633_v22 = vmax.f32 %v617_v5, 0.0  ;;  %v635_v28 = vmax.f32 %v619_v17, 0.0 }
 0x1e1   : > { %v588_v29 = vmul.f32 %v563_v60, %v491_v19  ;;  %v590_v15 = vmul.f32 %v571_v61, %v534_v20  ;;  %v493_v23 = vpop.f32.mrb[5].mxu0  ;;  %v536_v30 = vpop.f32.mrb[5].mxu1  ;;  %v640_v24 = vpack.c.bf16 %v632_v8, %v624_v6  ;;  %v642_v9 = vpack.c.bf16 %v634_v18, %v626_v11 }
 0x1e2   : > { %v589_v16 = vmul.f32 %v567_v0, %v493_v23  ;;  %v591_v31 = vmul.f32 %v575_v4, %v536_v30  ;;  %v495_v25 = vpop.f32.mrb[6].mxu0  ;;  %v538_v32 = vpop.f32.mrb[6].mxu1  ;;  %v641_v33 = vpack.c.bf16 %v633_v22, %v625_v21  ;;  %v643_v34 = vpack.c.bf16 %v635_v28, %v627_v27 }
 0x1e3   : > { %v612_v35 = vadd.f32 %v602_v43, %v588_v29  ;;  %v614_v36 = vadd.f32 %v602_v43, %v590_v15  ;;  %v596_v26 = vmul.f32 %v563_v60, %v495_v25  ;;  %v598_v37 = vmul.f32 %v571_v61, %v538_v32  ;;  %v497_v38 = vpop.f32.mrb[7].mxu0  ;;  %v540_v39 = vpop.f32.mrb[7].mxu1 }
 0x1e4   : > { %v613_v40 = vadd.f32 %v602_v43, %v589_v16  ;;  %v615_v41 = vadd.f32 %v602_v43, %v591_v31  ;;  %v597_v42 = vmul.f32 %v567_v0, %v497_v38  ;;  %v599_v3 = vmul.f32 %v575_v4, %v540_v39  ;;  %661 = vmatprep.subr.bf16.mxu0 %v641_v33 }
 0x1e5   : > { %v620_v2 = vadd.f32 %v1688_v44, %v596_v26  ;;  %v622_v45 = vadd.f32 %v1688_v44, %v598_v37  ;;  %704 = vmatprep.subr.bf16.mxu1 %v643_v34  ;;  %662 = vmatpush1.bf16.msra.mxu0 %v640_v24  ;;  %v628_v48 = vmax.f32 %v612_v35, 0.0  ;;  %v630_v49 = vmax.f32 %v614_v36, 0.0 }
 0x1e6   : > { %v621_v47 = vadd.f32 %v1688_v44, %v597_v42  ;;  %v623_v13 = vadd.f32 %v1688_v44, %v599_v3  ;;  %705 = vmatpush1.bf16.msra.mxu1 %v642_v9  ;;  %v629_v43 = vmax.f32 %v613_v40, 0.0  ;;  %v631_v51 = vmax.f32 %v615_v41, 0.0  ;;  %v1716_v44 = vpop.permute.xlu1 %653 }
 0x1e7   : > { %v636_v50 = vmax.f32 %v620_v2, 0.0  ;;  %v638_v14 = vmax.f32 %v622_v45, 0.0  ;;  %v1415_v11 = vmov 1966171168  }
 0x1e8   : > { %v637_v52 = vmax.f32 %v621_v47, 0.0  ;;  %v639_v53 = vmax.f32 %v623_v13, 0.0  ;;  %1145 = vmatmul.mubr.msk.bf16.vlgmr.msra.gmra.mrb[8].mxu0 %vm367_vm0, %v657_v46  ;;  %v1727_v18 = vunpack.c.l.s4 %v1415_v11 }
 0x1e9   : > { %v644_v10 = vpack.c.bf16 %v636_v50, %v628_v48  ;;  %v646_v54 = vpack.c.bf16 %v638_v14, %v630_v49  ;;  %1146 = vmatmul.mubr.msk.bf16.vlgmr.msra.gmra.mrb[8].mxu1 %vm367_vm0, %v657_v46  ;;  %779 = vmatprep.mubr.bf16.mxu0 %v1408_v1 }
 0x1ea   : > { %v645_v55 = vpack.c.bf16 %v637_v52, %v629_v43  ;;  %v647_v56 = vpack.c.bf16 %v639_v53, %v631_v51  ;;  %822 = vmatprep.mubr.bf16.mxu1 %v1408_v1  ;;  %v1718_v12 = vpop.permute.xlu1 %854  ;;  %v964_v25 = vunpack.c.0.s8 %v1727_v18 }
 0x1ec   : > { %747 = vmatprep.subr.bf16.mxu0 %v645_v55  ;;  %790 = vmatprep.subr.bf16.mxu1 %v647_v56 }
 0x1ed   : > { %748 = vmatpush1.bf16.msra.mxu0 %v644_v10  ;;  %791 = vmatpush1.bf16.msra.mxu1 %v646_v54 }
 0x1ee   : > { %v851_v22 = vpop.permute.xlu1 %850 }
 0x1f0   : > { %1147 = vmatmul.mubr.msk.bf16.vlgmr.msra.gmra.mrb[12].mxu0 %vm367_vm0, %v657_v46 }
 0x1f1   : > { %1148 = vmatmul.mubr.msk.bf16.vlgmr.msra.gmra.mrb[12].mxu1 %vm367_vm0, %v657_v46 }
 0x2bb   : > { %v695_v58 = vpop.f32.mrb[8].mxu0 }
 0x2bc   : > { %v738_v59 = vpop.f32.mrb[8].mxu1  ;;  %v697_v60 = vpop.f32.mrb[9].mxu0  ;;  %v696_v61 = vadd.f32 %v695_v58, %v1720_v57 }
 0x2bd   : > { %v740_v1 = vpop.f32.mrb[9].mxu1  ;;  %v699_v62 = vpop.f32.mrb[10].mxu0  ;;  %v698_v63 = vadd.f32 %v697_v60, %v1720_v57  ;;  %v739_v0 = vadd.f32 %v738_v59, %v1720_v57 }
 0x2be   : > { %v700_v4 = vadd.f32 %v699_v62, %v1716_v44  ;;  %v742_v5 = vpop.f32.mrb[10].mxu1  ;;  %v701_v17 = vpop.f32.mrb[11].mxu0  ;;  %v741_v6 = vadd.f32 %v740_v1, %v1720_v57  ;;  %v833_v8 = vmax.f32 %v696_v61, 0.0 }
 0x2bf   : > { %v743_v19 = vadd.f32 %v742_v5, %v1716_v44  ;;  %v702_v20 = vadd.f32 %v701_v17, %v1716_v44  ;;  %v744_v21 = vpop.f32.mrb[11].mxu1  ;;  %v834_v27 = vmax.f32 %v698_v63, 0.0  ;;  %v835_v28 = vmax.f32 %v739_v0, 0.0 }
 0x2c0   : > { %v841_v29 = vmax.f32 %v700_v4, 0.0  ;;  %v745_v15 = vadd.f32 %v744_v21, %v1716_v44  ;;  %v836_v23 = vmax.f32 %v741_v6, 0.0  ;;  %v857_v31 = vmul.f32 %v851_v22, %v833_v8 }
 0x2c1   : > { %v843_v30 = vmax.f32 %v743_v19, 0.0  ;;  %v842_v24 = vmax.f32 %v702_v20, 0.0  ;;  %v858_v34 = vmul.f32 %v851_v22, %v834_v27  ;;  %v859_v35 = vmul.f32 %v851_v22, %v835_v28 }
 0x2c2   : > { %v865_v9 = vmul.f32 %v1718_v12, %v841_v29  ;;  %v844_v16 = vmax.f32 %v745_v15, 0.0  ;;  %v860_v37 = vmul.f32 %v851_v22, %v836_v23 }
 0x2c3   : > { %v867_v32 = vmul.f32 %v1718_v12, %v843_v30  ;;  %v866_v33 = vmul.f32 %v1718_v12, %v842_v24  ;;  %v781_v36 = vpop.f32.mrb[12].mxu0 }
 0x2c4   : > { %v868_v26 = vmul.f32 %v1718_v12, %v844_v16  ;;  %v874_v38 = vsel %vm873_vm1, %v865_v9, 0.0  ;;  %v782_v39 = vadd.f32 %v781_v36, %v1720_v57  ;;  %v824_v40 = vpop.f32.mrb[12].mxu1  ;;  %v783_v41 = vpop.f32.mrb[13].mxu0 }
 0x2c5   : > { %v882_v42 = vsel %vm873_vm1, %v866_v33, 0.0  ;;  %v875_v3 = vadd.f32 %v874_v38, %v857_v31  ;;  %v890_v2 = vsel %vm873_vm1, %v867_v32, 0.0  ;;  %v825_v45 = vadd.f32 %v824_v40, %v1720_v57  ;;  %v826_v46 = vpop.f32.mrb[13].mxu1  ;;  %v785_v47 = vpop.f32.mrb[14].mxu0 }
 0x2c6   : > { %v898_v13 = vsel %vm873_vm1, %v868_v26, 0.0  ;;  %v883_v48 = vadd.f32 %v882_v42, %v858_v34  ;;  %v891_v49 = vadd.f32 %v890_v2, %v859_v35  ;;  %v837_v50 = vmax.f32 %v782_v39, 0.0  ;;  %v828_v14 = vpop.f32.mrb[14].mxu1  ;;  %v787_v43 = vpop.f32.mrb[15].mxu0 }
 0x2c7   : > { %v876_v51 = vrot.slane %v875_v3, 4  ;;  %v899_v52 = vadd.f32 %v898_v13, %v860_v37  ;;  %v839_v53 = vmax.f32 %v825_v45, 0.0  ;;  %v784_v10 = vadd.f32 %v783_v41, %v1720_v57  ;;  %v830_v54 = vpop.f32.mrb[15].mxu1  ;;  %v940_v38 = vpop.permute.xlu0 %939 }
 0x2c8   : > { %v884_v55 = vrot.slane %v883_v48, 4  ;;  %v892_v56 = vrot.slane %v891_v49, 4  ;;  %v861_v58 = vmul.f32 %v851_v22, %v837_v50  ;;  %v827_v59 = vadd.f32 %v826_v46, %v1720_v57 }
 0x2c9   : > { %v877_v60 = vadd.f32 %v876_v51, %v875_v3  ;;  %v900_v61 = vrot.slane %v899_v52, 4  ;;  %v863_v1 = vmul.f32 %v851_v22, %v839_v53  ;;  %v838_v62 = vmax.f32 %v784_v10, 0.0 }
 0x2ca   : > { %v885_v63 = vadd.f32 %v884_v55, %v883_v48  ;;  %v893_v0 = vadd.f32 %v892_v56, %v891_v49  ;;  %v840_v4 = vmax.f32 %v827_v59, 0.0  ;;  %v786_v5 = vadd.f32 %v785_v47, %v1716_v44 }
 0x2cb   : > { %v901_v17 = vadd.f32 %v900_v61, %v899_v52  ;;  %v862_v6 = vmul.f32 %v851_v22, %v838_v62  ;;  %v829_v8 = vadd.f32 %v828_v14, %v1716_v44  ;;  %v788_v11 = vadd.f32 %v787_v43, %v1716_v44 }
 0x2cc   : > { %v864_v19 = vmul.f32 %v851_v22, %v840_v4  ;;  %v845_v20 = vmax.f32 %v786_v5, 0.0  ;;  %v831_v21 = vadd.f32 %v830_v54, %v1716_v44  ;;  %v878_v57 = vrot.slane %v877_v60, 2 }
 0x2cd   : > { %v847_v27 = vmax.f32 %v829_v8, 0.0  ;;  %v846_v28 = vmax.f32 %v788_v11, 0.0  ;;  %v886_v29 = vrot.slane %v885_v63, 2  ;;  %v894_v15 = vrot.slane %v893_v0, 2 }
 0x2ce   : > { %v869_v23 = vmul.f32 %v1718_v12, %v845_v20  ;;  %v848_v30 = vmax.f32 %v831_v21, 0.0  ;;  %v879_v24 = vadd.f32 %v878_v57, %v877_v60  ;;  %v902_v9 = vrot.slane %v901_v17, 2 }
 0x2cf   : > { %v871_v16 = vmul.f32 %v1718_v12, %v847_v27  ;;  %v870_v31 = vmul.f32 %v1718_v12, %v846_v28  ;;  %v887_v32 = vadd.f32 %v886_v29, %v885_v63  ;;  %v895_v33 = vadd.f32 %v894_v15, %v893_v0 }
 0x2d0   : > { %v906_v22 = vsel %vm873_vm1, %v869_v23, 0.0  ;;  %v872_v44 = vmul.f32 %v1718_v12, %v848_v30  ;;  %v880_v34 = vrot.slane %v879_v24, 1  ;;  %v903_v35 = vadd.f32 %v902_v9, %v901_v17 }
 0x2d1   : > { %v907_v36 = vadd.f32 %v906_v22, %v861_v58  ;;  %v922_v26 = vsel %vm873_vm1, %v871_v16, 0.0  ;;  %v914_v37 = vsel %vm873_vm1, %v870_v31, 0.0  ;;  %v888_v39 = vrot.slane %v887_v32, 1 }
 0x2d2   : > { %v923_v40 = vadd.f32 %v922_v26, %v863_v1  ;;  %v915_v41 = vadd.f32 %v914_v37, %v862_v6  ;;  %v930_v42 = vsel %vm873_vm1, %v872_v44, 0.0  ;;  %v881_v3 = vadd.f32 %v880_v34, %v879_v24 }
 0x2d3   : > { %v908_v2 = vrot.slane %v907_v36, 4  ;;  %v931_v45 = vadd.f32 %v930_v42, %v864_v19  ;;  %v889_v46 = vadd.f32 %v888_v39, %v887_v32  ;;  %v896_v47 = vrot.slane %v895_v33, 1 }
 0x2d4   : > { %v924_v13 = vrot.slane %v923_v40, 4  ;;  %v916_v12 = vrot.slane %v915_v41, 4  ;;  %v904_v48 = vrot.slane %v903_v35, 1  ;;  %v942_v49 = vadd.f32 %v940_v38, %v881_v3 }
 0x2d5   : > { %v909_v50 = vadd.f32 %v908_v2, %v907_v36  ;;  %v932_v14 = vrot.slane %v931_v45, 4  ;;  %v897_v43 = vadd.f32 %v896_v47, %v895_v33  ;;  %v943_v51 = vadd.f32 %v940_v38, %v889_v46 }
 0x2d6   : > { %v925_v52 = vadd.f32 %v924_v13, %v923_v40  ;;  %v917_v53 = vadd.f32 %v916_v12, %v915_v41  ;;  %v905_v10 = vadd.f32 %v904_v48, %v903_v35  ;;  %v967_v54 = vsub.s32 %v964_v25, %v1630_v7 }
 0x2d7   : > { %v910_v55 = vrot.slane %v909_v50, 2  ;;  %v933_v56 = vadd.f32 %v932_v14, %v931_v45  ;;  %v944_v58 = vadd.f32 %v940_v38, %v897_v43  ;;  %v958_v59 = vcombine.low %v942_v49, %v943_v51 }
 0x2d8   : > { %v926_v60 = vrot.slane %v925_v52, 2  ;;  %v918_v61 = vrot.slane %v917_v53, 2  ;;  %v945_v1 = vadd.f32 %v940_v38, %v905_v10 }
 0x2d9   : > { %v911_v62 = vadd.f32 %v910_v55, %v909_v50  ;;  %v934_v63 = vrot.slane %v933_v56, 2  ;;  %v968_v17 = vrot.slane %v958_v59, %v967_v54 }
 0x2da   : > { %v927_v0 = vadd.f32 %v926_v60, %v925_v52  ;;  %v919_v4 = vadd.f32 %v918_v61, %v917_v53  ;;  %v959_v5 = vcombine.low %v944_v58, %v945_v1 }
 0x2db   : > { %v912_v6 = vrot.slane %v911_v62, 1  ;;  %v935_v8 = vadd.f32 %v934_v63, %v933_v56 }
 0x2dc   : > { %v928_v11 = vrot.slane %v927_v0, 1  ;;  %v920_v19 = vrot.slane %v919_v4, 1  ;;  %v975_v20 = vrot.slane %v959_v5, %v967_v54 }
 0x2dd   : > { %v913_v7 = vadd.f32 %v912_v6, %v911_v62  ;;  %v936_v18 = vrot.slane %v935_v8, 1 }
 0x2de   : > { %v929_v25 = vadd.f32 %v928_v11, %v927_v0  ;;  %v921_v21 = vadd.f32 %v920_v19, %v919_v4  ;;  %v990_v57 = vcombine.low %v968_v17, %v975_v20 }
 0x2df   : > { %v937_v27 = vadd.f32 %v936_v18, %v935_v8  ;;  %v946_v28 = vadd.f32 %v940_v38, %v913_v7 }
 0x2e0   : > { %v947_v29 = vadd.f32 %v940_v38, %v921_v21  ;;  %v948_v15 = vadd.f32 %v940_v38, %v929_v25  ;;  %v998_v32 = vrot.slane %v990_v57, %v967_v54 }
 0x2e1   : > { %v949_v23 = vadd.f32 %v940_v38, %v937_v27 }
 0x2e2   : > { %v960_v30 = vcombine.low %v946_v28, %v947_v29 }
 0x2e3   : > { %v961_v24 = vcombine.low %v948_v15, %v949_v23 }
 0x2e4   : > { %v982_v9 = vrot.slane %v960_v30, %v967_v54 }
 0x2e5   : > { %v989_v16 = vrot.slane %v961_v24, %v967_v54 }
 0x2e7   : > { %v991_v31 = vcombine.low %v982_v9, %v989_v16 }
 0x2e9   : > { %v1005_v33 = vrot.slane %v991_v31, %v967_v54 }
 0x2eb   : > { %v1006_v22 = vcombine.low %v998_v32, %v1005_v33 }
 0x2ed   : > { %1008 = vst [vmem:[%s238_s27] sm:$0xff] %v1006_v22 }
 0x2ee   : > { %1339 = shalt.err (!%p1336_p2)
}
 0x2ef   : > { %s1340_s9 = scalar_lea.hbm %s1765_s29, 128  ;;  %s1344_s20 = scalar_lea.hbm %s1811_s3, 512 }
 0x2f0   : > { %p1341_p4 = scmp.ne.s32.totalorder %s1765_s29, %s1340_s9  ;;  %p1345_p12 = scmp.lt.u32.totalorder %s1765_s29, %s1811_s3 }
 0x2f1   : > { %p1346_p10 = scmp.lt.u32.totalorder %s1344_s20, %s1340_s9  ;;  %p1348_p8 = scmp.lt.u32.totalorder %s1340_s9, %s1765_s29 }
 0x2f2   : > { %p1342_p6 = pnand %p1341_p4, %p1827_p13 }
 0x2f3   : > { %p1347_p0 = por %p1346_p10, %p1345_p12 }
 0x2f4   : > { %p1343_p1 = pneg %p1342_p6 }
 0x2f5   : > { %p1349_p3 = por %p1348_p8, %p1347_p0 }
 0x2f7   : > { %p1350_p7 = pnand %p1349_p3, %p1343_p1 }
 0x2f9   : > { %1353 = shalt.err (!%p1350_p7)
}
 0x2fa   : > { %1165 = dma.vmem_to_hbm [thread:$0]  (%p1827_p13), %s1767_s28, 128, %s1765_s29, %s1010_s22  }
 0x2fb PF: > { %p1185_p9 = scmp.ge.s32.totalorder %s1400_s15, 2  ;;  %s1036_s18 = sand.u32 1, %s1388_s12  }
 0x2fc   : > { %p1828_p11 = scmp.ne.s32.totalorder %s1817_s19, 0  ;;  %s1037_s11 = scalar_lea.sflag [#allocation4], %s1036_s18 }
 0x2fe   : > { %p1179_p5 = pnand %p1185_p9, %p1828_p11 }
 0x300   : > { %1383 = dma.done.wait (!%p1179_p5), %s1037_s11, 128  }
 0x301   : > { %1385 = vsyncadd (!%p1179_p5), %s1037_s11, 4294967168  ;;  %p19_p2 = scmp.ge.s32.totalorder %s1490_s24, 6   ;;  %s1829_s12 = smov %s1392_s13 }
 0x302   : > { %s1830_s13 = smov %s1396_s14  ;;  %s1831_s14 = smov %s1516_s17 }
 0x303   : > { %s1832_s15 = smov %s1490_s24  ;;  %21 = sbr.rel (!%p19_p2) target bundleno = 7 (0x7), region = 94 }
 0x30a   :  { %1042 = vsyncpa [#allocation3], 1 }
 0x30b   :  { %1044 = vsyncpa [#allocation3 + $0x1], 1 }
 0x30c   :  { %1045 = vsyncpa [#allocation6], 1 }
 0x30d   :  { %1047 = vsyncpa [#allocation6 + $0x1], 1 }
 0x30e   :  { %1048 = vsyncpa [#allocation4], 1 }
 0x30f   :  { %1050 = vsyncpa [#allocation4 + $0x1], 1 }

</bundles_post_ra>
